<compile_context>
chip_gen: v6e
topology: v6e:2x2x1
jax: 0.10.0
libtpu: 0.0.40
codegen_flags: <defaults>
</compile_context>

<pallas_src>
import functools

import jax
import jax.numpy as jnp
from jax.experimental import pallas as pl
from jax.experimental.pallas import tpu as pltpu


def _round_up(x, m):
    return (x + m - 1) // m * m


def _sigmoid(x):
    return 1.0 / (1.0 + jnp.exp(-x))


# ----------------------------------------------------------------------------
# Fused MDRNNCell kernel
# ----------------------------------------------------------------------------
def _mdrnn_cell_kernel(act_ref, lat_ref, h_ref, c_ref,
                       w_a_ref, w_l_ref, w_h_ref, b_ref,
                       w_g_ref, b_g_ref,
                       h_out_ref, c_out_ref, gmm_out_ref,
                       *, hiddens, stride, gaussians):
    f32 = jnp.float32
    bf16 = jnp.bfloat16
    H = hiddens

    # LSTMCell gates (PyTorch gate order i, f, g, o). bf16 MXU, f32 accumulate.
    gates = (
        jnp.dot(act_ref[...].astype(bf16), w_a_ref[...], preferred_element_type=f32)
        + jnp.dot(lat_ref[...].astype(bf16), w_l_ref[...], preferred_element_type=f32)
        + jnp.dot(h_ref[...].astype(bf16), w_h_ref[...], preferred_element_type=f32)
        + b_ref[...]
    )
    i_g = _sigmoid(gates[:, 0 * H:1 * H])
    f_g = _sigmoid(gates[:, 1 * H:2 * H])
    g_g = jnp.tanh(gates[:, 2 * H:3 * H])
    o_g = _sigmoid(gates[:, 3 * H:4 * H])

    c_new = f_g * c_ref[...].astype(f32) + i_g * g_g
    h_new = o_g * jnp.tanh(c_new)
    h_out_ref[...] = h_new.astype(h_out_ref.dtype)
    c_out_ref[...] = c_new.astype(c_out_ref.dtype)

    # gmm_linear head; columns zero-padded to a multiple of 128 (lane-dense).
    out = (jnp.dot(h_new.astype(bf16), w_g_ref[...], preferred_element_type=f32)
           + b_g_ref[...])

    # Post-processing with column-index masks (no unaligned slicing in-kernel).
    col = jax.lax.broadcasted_iota(jnp.int32, out.shape, 1)
    sig_mask = (col >= stride) & (col < 2 * stride)
    pi_mask = (col >= 2 * stride) & (col < 2 * stride + gaussians)

    out = jnp.where(sig_mask, jnp.exp(out), out)                 # sigmas = exp(.)

    neg_big = jnp.float32(-1e30)
    pi_vals = jnp.where(pi_mask, out, neg_big)
    pi_max = jnp.max(pi_vals, axis=1, keepdims=True)
    pi_sum = jnp.sum(jnp.where(pi_mask, jnp.exp(out - pi_max), 0.0),
                     axis=1, keepdims=True)
    pi_lse = pi_max + jnp.log(pi_sum)
    out = jnp.where(pi_mask, out - pi_lse, out)                  # logpi = log_softmax

    gmm_out_ref[...] = out.astype(gmm_out_ref.dtype)


# ----------------------------------------------------------------------------
# Parameters (PyTorch layout) + one-time host-side prep for the kernel
# ----------------------------------------------------------------------------
def init_mdrnn_params(key, latents, actions, hiddens, gaussians):
    out_dim = (2 * latents + 1) * gaussians + 2
    in_dim = latents + actions
    ks = jax.random.split(key, 6)
    s = 1.0 / float(hiddens) ** 0.5
    u = lambda k, shape: jax.random.uniform(k, shape, jnp.float32, -s, s)
    return {
        "weight_ih": u(ks[0], (4 * hiddens, in_dim)),
        "weight_hh": u(ks[1], (4 * hiddens, hiddens)),
        "bias_ih": u(ks[2], (4 * hiddens,)),
        "bias_hh": u(ks[3], (4 * hiddens,)),
        "gmm_weight": u(ks[4], (out_dim, hiddens)),
        "gmm_bias": u(ks[5], (out_dim,)),
    }


def prep_kernel_params(params, latents, actions, hiddens, gaussians):
    """Transpose/split/pad/cast once on the host; avoids runtime layout ops."""
    out_dim = (2 * latents + 1) * gaussians + 2
    out_pad = _round_up(out_dim, 128)
    w_ih_t = params["weight_ih"].T                                 # (A+L, 4H)
    w_a = w_ih_t[:actions].astype(jnp.bfloat16)                    # (A, 4H)
    w_l = w_ih_t[actions:].astype(jnp.bfloat16)                    # (L, 4H)
    w_h = params["weight_hh"].T.astype(jnp.bfloat16)               # (H, 4H)
    b = (params["bias_ih"] + params["bias_hh"]).reshape(1, 4 * hiddens)
    b = b.astype(jnp.float32)
    w_g = jnp.zeros((hiddens, out_pad), jnp.float32)
    w_g = w_g.at[:, :out_dim].set(params["gmm_weight"].T).astype(jnp.bfloat16)
    b_g = jnp.zeros((1, out_pad), jnp.float32).at[:, :out_dim].set(params["gmm_bias"])
    return {"w_a": w_a, "w_l": w_l, "w_h": w_h, "b": b, "w_g": w_g, "b_g": b_g}


# ----------------------------------------------------------------------------
# Forward wrapper
# ----------------------------------------------------------------------------
def mdrnn_cell_forward(kparams, action, latent, hidden, *,
                       latents, actions, hiddens, gaussians, max_tile_b=256):
    h, c = hidden
    B = action.shape[0]
    H = hiddens
    stride = gaussians * latents
    out_pad = kparams["w_g"].shape[1]

    # Batch tiling: pad B so the grid divides evenly (no-op at small B).
    if B <= max_tile_b:
        tile_b, b_pad = B, B
    else:
        tile_b = max_tile_b
        b_pad = _round_up(B, tile_b)

    def pad_b(x):
        x = x.astype(jnp.float32)
        return x if x.shape[0] == b_pad else jnp.pad(x, ((0, b_pad - x.shape[0]), (0, 0)))

    act, lat, h0, c0 = pad_b(action), pad_b(latent), pad_b(h), pad_b(c)

    row_spec = lambda w: pl.BlockSpec((tile_b, w), lambda i: (i, 0))
    full_spec = lambda r, ccols: pl.BlockSpec((r, ccols), lambda i: (0, 0))

    kernel = functools.partial(_mdrnn_cell_kernel, hiddens=H, stride=stride,
                               gaussians=gaussians)

    h_new, c_new, out = pl.pallas_call(
        kernel,
        out_shape=(
            jax.ShapeDtypeStruct((b_pad, H), jnp.float32),
            jax.ShapeDtypeStruct((b_pad, H), jnp.float32),
            jax.ShapeDtypeStruct((b_pad, out_pad), jnp.float32),
        ),
        grid=(b_pad // tile_b,),
        in_specs=[
            row_spec(actions), row_spec(latents), row_spec(H), row_spec(H),
            full_spec(actions, 4 * H), full_spec(latents, 4 * H),
            full_spec(H, 4 * H), full_spec(1, 4 * H),
            full_spec(H, out_pad), full_spec(1, out_pad),
        ],
        out_specs=(row_spec(H), row_spec(H), row_spec(out_pad)),
        compiler_params=pltpu.CompilerParams(dimension_semantics=("parallel",)),
    )(act, lat, h0, c0,
      kparams["w_a"], kparams["w_l"], kparams["w_h"], kparams["b"],
      kparams["w_g"], kparams["b_g"])

    h_new, c_new, out = h_new[:B], c_new[:B], out[:B]

    mus = out[:, :stride].reshape(B, gaussians, latents)
    sigmas = out[:, stride:2 * stride].reshape(B, gaussians, latents)
    logpi = out[:, 2 * stride:2 * stride + gaussians]
    r = out[:, 2 * stride + gaussians]
    d = out[:, 2 * stride + gaussians + 1]
    return mus, sigmas, logpi, r, d, (h_new, c_new)


# ----------------------------------------------------------------------------
# Pure-JAX f32 reference (mirrors the PyTorch module)
# ----------------------------------------------------------------------------
def mdrnn_cell_reference(params, action, latent, hidden, *, latents, gaussians):
    h, c = hidden
    H = h.shape[1]
    x = jnp.concatenate([action, latent], axis=1)
    gates = (x @ params["weight_ih"].T + params["bias_ih"]
             + h @ params["weight_hh"].T + params["bias_hh"])
    i = jax.nn.sigmoid(gates[:, :H])
    f = jax.nn.sigmoid(gates[:, H:2 * H])
    g = jnp.tanh(gates[:, 2 * H:3 * H])
    o = jax.nn.sigmoid(gates[:, 3 * H:4 * H])
    c_new = f * c + i * g
    h_new = o * jnp.tanh(c_new)
    out_full = h_new @ params["gmm_weight"].T + params["gmm_bias"]
    stride = gaussians * latents
    mus = out_full[:, :stride].reshape(-1, gaussians, latents)
    sigmas = jnp.exp(out_full[:, stride:2 * stride]).reshape(-1, gaussians, latents)
    logpi = jax.nn.log_softmax(out_full[:, 2 * stride:2 * stride + gaussians], axis=-1)
    return mus, sigmas, logpi, out_full[:, -2], out_full[:, -1], (h_new, c_new)


if __name__ == "__main__":
    LATENTS, ACTIONS, HIDDENS, GAUSSIANS = 32, 3, 128, 5
    BATCH = 8

    key = jax.random.PRNGKey(0)
    kp, ka, kl, kh, kc = jax.random.split(key, 5)
    params = init_mdrnn_params(kp, LATENTS, ACTIONS, HIDDENS, GAUSSIANS)
    kparams = prep_kernel_params(params, LATENTS, ACTIONS, HIDDENS, GAUSSIANS)

    action = jax.random.normal(ka, (BATCH, ACTIONS), jnp.float32)
    latent = jax.random.normal(kl, (BATCH, LATENTS), jnp.float32)
    h0 = 0.1 * jax.random.normal(kh, (BATCH, HIDDENS), jnp.float32)
    c0 = 0.1 * jax.random.normal(kc, (BATCH, HIDDENS), jnp.float32)

    fwd = jax.jit(functools.partial(mdrnn_cell_forward, latents=LATENTS,
                                    actions=ACTIONS, hiddens=HIDDENS,
                                    gaussians=GAUSSIANS))
    mus, sigmas, logpi, r, d, (h1, c1) = fwd(kparams, action, latent, (h0, c0))
    jax.block_until_ready((mus, sigmas, logpi, r, d, h1, c1))

    assert mus.shape == (BATCH, GAUSSIANS, LATENTS)
    assert sigmas.shape == (BATCH, GAUSSIANS, LATENTS)
    assert logpi.shape == (BATCH, GAUSSIANS)
    assert r.shape == (BATCH,) and d.shape == (BATCH,)
    assert h1.shape == (BATCH, HIDDENS) and c1.shape == (BATCH, HIDDENS)

    # Correctness vs f32 reference (kernel matmuls run in bf16 -> loose tol).
    ref = mdrnn_cell_reference(params, action, latent, (h0, c0),
                               latents=LATENTS, gaussians=GAUSSIANS)
    for got, want in zip((mus, sigmas, logpi, r, d, h1, c1),
                         (*ref[:5], *ref[5])):
        err = float(jnp.max(jnp.abs(got - want)))
        assert jnp.allclose(got, want, atol=5e-2, rtol=5e-2), err

    print("KERNEL_OK")
</pallas_src>

<mosaic_0001>
module attributes {stable_mosaic.version = 11 : i64} {
  func.func @_mdrnn_cell_kernel(%arg0: i32, %arg1: memref<8x3xf32, #tpu.memory_space<vmem>>, %arg2: memref<8x32xf32, #tpu.memory_space<vmem>>, %arg3: memref<8x128xf32, #tpu.memory_space<vmem>>, %arg4: memref<8x128xf32, #tpu.memory_space<vmem>>, %arg5: memref<3x512xbf16, #tpu.memory_space<vmem>>, %arg6: memref<32x512xbf16, #tpu.memory_space<vmem>>, %arg7: memref<128x512xbf16, #tpu.memory_space<vmem>>, %arg8: memref<1x512xf32, #tpu.memory_space<vmem>>, %arg9: memref<128x384xbf16, #tpu.memory_space<vmem>>, %arg10: memref<1x384xf32, #tpu.memory_space<vmem>>, %arg11: memref<8x128xf32, #tpu.memory_space<vmem>>, %arg12: memref<8x128xf32, #tpu.memory_space<vmem>>, %arg13: memref<8x384xf32, #tpu.memory_space<vmem>>) attributes {dimension_semantics = [#tpu.dimension_semantics<parallel>], iteration_bounds = array<i64: 1>, scalar_prefetch = 0 : i64, scratch_operands = 0 : i64, tpu.core_type = #tpu.core_type<tc>, window_params = [{transform_indices = @transform_0, window_bounds = array<i64: 8, 3>}, {transform_indices = @transform_1, window_bounds = array<i64: 8, 32>}, {transform_indices = @transform_2, window_bounds = array<i64: 8, 128>}, {transform_indices = @transform_3, window_bounds = array<i64: 8, 128>}, {pipeline_mode = #tpu.pipeline_mode<synchronous>, transform_indices = @transform_4, window_bounds = array<i64: 3, 512>}, {pipeline_mode = #tpu.pipeline_mode<synchronous>, transform_indices = @transform_5, window_bounds = array<i64: 32, 512>}, {pipeline_mode = #tpu.pipeline_mode<synchronous>, transform_indices = @transform_6, window_bounds = array<i64: 128, 512>}, {pipeline_mode = #tpu.pipeline_mode<synchronous>, transform_indices = @transform_7, window_bounds = array<i64: 1, 512>}, {pipeline_mode = #tpu.pipeline_mode<synchronous>, transform_indices = @transform_8, window_bounds = array<i64: 128, 384>}, {pipeline_mode = #tpu.pipeline_mode<synchronous>, transform_indices = @transform_9, window_bounds = array<i64: 1, 384>}, {transform_indices = @transform_10, window_bounds = array<i64: 8, 128>}, {transform_indices = @transform_11, window_bounds = array<i64: 8, 128>}, {transform_indices = @transform_12, window_bounds = array<i64: 8, 384>}]} {
    %c0 = arith.constant 0 : index
    %c0_0 = arith.constant 0 : index
    %0 = vector.load %arg1[%c0, %c0_0] : memref<8x3xf32, #tpu.memory_space<vmem>>, vector<8x3xf32>
    %1 = arith.truncf %0 : vector<8x3xf32> to vector<8x3xbf16>
    %c0_1 = arith.constant 0 : index
    %c0_2 = arith.constant 0 : index
    %2 = vector.load %arg5[%c0_1, %c0_2] : memref<3x512xbf16, #tpu.memory_space<vmem>>, vector<3x512xbf16>
    %cst = arith.constant dense<0.000000e+00> : vector<8x512xf32>
    %3 = tpu.matmul %1, %2, %cst {dimension_numbers = #tpu.dot_dimension_numbers<[1], [0], [0], [1], [0, 0, 1, 1], [], []>} : vector<8x3xbf16>, vector<3x512xbf16>, vector<8x512xf32> -> vector<8x512xf32>
    %c0_3 = arith.constant 0 : index
    %c0_4 = arith.constant 0 : index
    %4 = vector.load %arg2[%c0_3, %c0_4] : memref<8x32xf32, #tpu.memory_space<vmem>>, vector<8x32xf32>
    %5 = arith.truncf %4 : vector<8x32xf32> to vector<8x32xbf16>
    %c0_5 = arith.constant 0 : index
    %c0_6 = arith.constant 0 : index
    %6 = vector.load %arg6[%c0_5, %c0_6] : memref<32x512xbf16, #tpu.memory_space<vmem>>, vector<32x512xbf16>
    %cst_7 = arith.constant dense<0.000000e+00> : vector<8x512xf32>
    %7 = tpu.matmul %5, %6, %cst_7 {dimension_numbers = #tpu.dot_dimension_numbers<[1], [0], [0], [1], [0, 0, 1, 1], [], []>} : vector<8x32xbf16>, vector<32x512xbf16>, vector<8x512xf32> -> vector<8x512xf32>
    %8 = arith.addf %3, %7 : vector<8x512xf32>
    %c0_8 = arith.constant 0 : index
    %c0_9 = arith.constant 0 : index
    %9 = vector.load %arg3[%c0_8, %c0_9] : memref<8x128xf32, #tpu.memory_space<vmem>>, vector<8x128xf32>
    %10 = arith.truncf %9 : vector<8x128xf32> to vector<8x128xbf16>
    %c0_10 = arith.constant 0 : index
    %c0_11 = arith.constant 0 : index
    %11 = vector.load %arg7[%c0_10, %c0_11] : memref<128x512xbf16, #tpu.memory_space<vmem>>, vector<128x512xbf16>
    %cst_12 = arith.constant dense<0.000000e+00> : vector<8x512xf32>
    %12 = tpu.matmul %10, %11, %cst_12 {dimension_numbers = #tpu.dot_dimension_numbers<[1], [0], [0], [1], [0, 0, 1, 1], [], []>} : vector<8x128xbf16>, vector<128x512xbf16>, vector<8x512xf32> -> vector<8x512xf32>
    %13 = arith.addf %8, %12 : vector<8x512xf32>
    %c0_13 = arith.constant 0 : index
    %c0_14 = arith.constant 0 : index
    %14 = vector.load %arg8[%c0_13, %c0_14] : memref<1x512xf32, #tpu.memory_space<vmem>>, vector<1x512xf32>
    %15 = vector.broadcast %14 : vector<1x512xf32> to vector<8x512xf32>
    %16 = arith.addf %13, %15 : vector<8x512xf32>
    %17 = vector.extract_strided_slice %16 {offsets = [0, 0], sizes = [8, 128], strides = [1, 1]} : vector<8x512xf32> to vector<8x128xf32>
    %cst_15 = arith.constant 0.000000e+00 : f32
    %18 = vector.broadcast %cst_15 : f32 to vector<8x128xf32>
    %19 = arith.subf %18, %17 : vector<8x128xf32>
    %20 = math.exp %19 : vector<8x128xf32>
    %cst_16 = arith.constant 1.000000e+00 : f32
    %21 = vector.broadcast %cst_16 : f32 to vector<8x128xf32>
    %22 = arith.addf %21, %20 : vector<8x128xf32>
    %cst_17 = arith.constant 1.000000e+00 : f32
    %23 = vector.broadcast %cst_17 : f32 to vector<8x128xf32>
    %24 = arith.divf %23, %22 : vector<8x128xf32>
    %25 = vector.extract_strided_slice %16 {offsets = [0, 128], sizes = [8, 128], strides = [1, 1]} : vector<8x512xf32> to vector<8x128xf32>
    %cst_18 = arith.constant 0.000000e+00 : f32
    %26 = vector.broadcast %cst_18 : f32 to vector<8x128xf32>
    %27 = arith.subf %26, %25 : vector<8x128xf32>
    %28 = math.exp %27 : vector<8x128xf32>
    %cst_19 = arith.constant 1.000000e+00 : f32
    %29 = vector.broadcast %cst_19 : f32 to vector<8x128xf32>
    %30 = arith.addf %29, %28 : vector<8x128xf32>
    %cst_20 = arith.constant 1.000000e+00 : f32
    %31 = vector.broadcast %cst_20 : f32 to vector<8x128xf32>
    %32 = arith.divf %31, %30 : vector<8x128xf32>
    %33 = vector.extract_strided_slice %16 {offsets = [0, 256], sizes = [8, 128], strides = [1, 1]} : vector<8x512xf32> to vector<8x128xf32>
    %34 = math.tanh %33 : vector<8x128xf32>
    %35 = vector.extract_strided_slice %16 {offsets = [0, 384], sizes = [8, 128], strides = [1, 1]} : vector<8x512xf32> to vector<8x128xf32>
    %cst_21 = arith.constant 0.000000e+00 : f32
    %36 = vector.broadcast %cst_21 : f32 to vector<8x128xf32>
    %37 = arith.subf %36, %35 : vector<8x128xf32>
    %38 = math.exp %37 : vector<8x128xf32>
    %cst_22 = arith.constant 1.000000e+00 : f32
    %39 = vector.broadcast %cst_22 : f32 to vector<8x128xf32>
    %40 = arith.addf %39, %38 : vector<8x128xf32>
    %cst_23 = arith.constant 1.000000e+00 : f32
    %41 = vector.broadcast %cst_23 : f32 to vector<8x128xf32>
    %42 = arith.divf %41, %40 : vector<8x128xf32>
    %c0_24 = arith.constant 0 : index
    %c0_25 = arith.constant 0 : index
    %43 = vector.load %arg4[%c0_24, %c0_25] : memref<8x128xf32, #tpu.memory_space<vmem>>, vector<8x128xf32>
    %44 = arith.mulf %32, %43 : vector<8x128xf32>
    %45 = arith.mulf %24, %34 : vector<8x128xf32>
    %46 = arith.addf %44, %45 : vector<8x128xf32>
    %47 = math.tanh %46 : vector<8x128xf32>
    %48 = arith.mulf %42, %47 : vector<8x128xf32>
    %c0_26 = arith.constant 0 : index
    %c0_27 = arith.constant 0 : index
    %49 = vector.load %arg11[%c0_26, %c0_27] : memref<8x128xf32, #tpu.memory_space<vmem>>, vector<8x128xf32>
    tpu.vector_store %arg11[%c0_26, %c0_27], %48 {strides = array<i32>} : memref<8x128xf32, #tpu.memory_space<vmem>>, vector<8x128xf32>,
    %c0_28 = arith.constant 0 : index
    %c0_29 = arith.constant 0 : index
    %50 = vector.load %arg12[%c0_28, %c0_29] : memref<8x128xf32, #tpu.memory_space<vmem>>, vector<8x128xf32>
    tpu.vector_store %arg12[%c0_28, %c0_29], %46 {strides = array<i32>} : memref<8x128xf32, #tpu.memory_space<vmem>>, vector<8x128xf32>,
    %51 = arith.truncf %48 : vector<8x128xf32> to vector<8x128xbf16>
    %c0_30 = arith.constant 0 : index
    %c0_31 = arith.constant 0 : index
    %52 = vector.load %arg9[%c0_30, %c0_31] : memref<128x384xbf16, #tpu.memory_space<vmem>>, vector<128x384xbf16>
    %cst_32 = arith.constant dense<0.000000e+00> : vector<8x384xf32>
    %53 = tpu.matmul %51, %52, %cst_32 {dimension_numbers = #tpu.dot_dimension_numbers<[1], [0], [0], [1], [0, 0, 1, 1], [], []>} : vector<8x128xbf16>, vector<128x384xbf16>, vector<8x384xf32> -> vector<8x384xf32>
    %c0_33 = arith.constant 0 : index
    %c0_34 = arith.constant 0 : index
    %54 = vector.load %arg10[%c0_33, %c0_34] : memref<1x384xf32, #tpu.memory_space<vmem>>, vector<1x384xf32>
    %55 = vector.broadcast %54 : vector<1x384xf32> to vector<8x384xf32>
    %56 = arith.addf %53, %55 : vector<8x384xf32>
    %57 = tpu.iota {dimensions = array<i32: 1>} : vector<8x384xi32>
    %c160_i32 = arith.constant 160 : i32
    %58 = vector.broadcast %c160_i32 : i32 to vector<8x384xi32>
    %59 = arith.cmpi sge, %57, %58 : vector<8x384xi32>
    %c320_i32 = arith.constant 320 : i32
    %60 = vector.broadcast %c320_i32 : i32 to vector<8x384xi32>
    %61 = arith.cmpi slt, %57, %60 : vector<8x384xi32>
    %62 = arith.andi %59, %61 : vector<8x384xi1>
    %c320_i32_35 = arith.constant 320 : i32
    %63 = vector.broadcast %c320_i32_35 : i32 to vector<8x384xi32>
    %64 = arith.cmpi sge, %57, %63 : vector<8x384xi32>
    %c325_i32 = arith.constant 325 : i32
    %65 = vector.broadcast %c325_i32 : i32 to vector<8x384xi32>
    %66 = arith.cmpi slt, %57, %65 : vector<8x384xi32>
    %67 = arith.andi %64, %66 : vector<8x384xi1>
    %68 = math.exp %56 : vector<8x384xf32>
    %69 = arith.select %62, %68, %56 : vector<8x384xi1>, vector<8x384xf32>
    %cst_36 = arith.constant -1.000000e+30 : f32
    %70 = vector.broadcast %cst_36 : f32 to vector<8x384xf32>
    %71 = arith.select %67, %69, %70 : vector<8x384xi1>, vector<8x384xf32>
    %cst_37 = arith.constant dense<0xFF800000> : vector<8xf32>
    %72 = vector.multi_reduction <maximumf>, %71, %cst_37 [1] : vector<8x384xf32> to vector<8xf32>
    %73 = vector.shape_cast %72 : vector<8xf32> to vector<8x1xf32>
    %74 = vector.broadcast %73 : vector<8x1xf32> to vector<8x384xf32>
    %75 = arith.subf %69, %74 : vector<8x384xf32>
    %76 = math.exp %75 : vector<8x384xf32>
    %cst_38 = arith.constant 0.000000e+00 : f32
    %77 = vector.broadcast %cst_38 : f32 to vector<8x384xf32>
    %78 = arith.select %67, %76, %77 : vector<8x384xi1>, vector<8x384xf32>
    %cst_39 = arith.constant dense<0.000000e+00> : vector<8xf32>
    %79 = vector.multi_reduction <add>, %78, %cst_39 [1] : vector<8x384xf32> to vector<8xf32>
    %80 = vector.shape_cast %79 : vector<8xf32> to vector<8x1xf32>
    %81 = math.log %80 : vector<8x1xf32>
    %82 = arith.addf %73, %81 : vector<8x1xf32>
    %83 = vector.broadcast %82 : vector<8x1xf32> to vector<8x384xf32>
    %84 = arith.subf %69, %83 : vector<8x384xf32>
    %85 = arith.select %67, %84, %69 : vector<8x384xi1>, vector<8x384xf32>
    %c0_40 = arith.constant 0 : index
    %c0_41 = arith.constant 0 : index
    %86 = vector.load %arg13[%c0_40, %c0_41] : memref<8x384xf32, #tpu.memory_space<vmem>>, vector<8x384xf32>
    tpu.vector_store %arg13[%c0_40, %c0_41], %85 {strides = array<i32>} : memref<8x384xf32, #tpu.memory_space<vmem>>, vector<8x384xf32>,
    return
  }
  func.func @transform_0(%arg0: i32) -> (i32, i32) {
    %c0_i32 = arith.constant 0 : i32
    %c0_i32_0 = arith.constant 0 : i32
    return %arg0, %c0_i32 : i32, i32
  }
  func.func @transform_1(%arg0: i32) -> (i32, i32) {
    %c0_i32 = arith.constant 0 : i32
    %c0_i32_0 = arith.constant 0 : i32
    return %arg0, %c0_i32 : i32, i32
  }
  func.func @transform_2(%arg0: i32) -> (i32, i32) {
    %c0_i32 = arith.constant 0 : i32
    %c0_i32_0 = arith.constant 0 : i32
    return %arg0, %c0_i32 : i32, i32
  }
  func.func @transform_3(%arg0: i32) -> (i32, i32) {
    %c0_i32 = arith.constant 0 : i32
    %c0_i32_0 = arith.constant 0 : i32
    return %arg0, %c0_i32 : i32, i32
  }
  func.func @transform_4(%arg0: i32) -> (i32, i32) {
    %c0_i32 = arith.constant 0 : i32
    %c0_i32_0 = arith.constant 0 : i32
    %c0_i32_1 = arith.constant 0 : i32
    return %c0_i32, %c0_i32_0 : i32, i32
  }
  func.func @transform_5(%arg0: i32) -> (i32, i32) {
    %c0_i32 = arith.constant 0 : i32
    %c0_i32_0 = arith.constant 0 : i32
    %c0_i32_1 = arith.constant 0 : i32
    return %c0_i32, %c0_i32_0 : i32, i32
  }
  func.func @transform_6(%arg0: i32) -> (i32, i32) {
    %c0_i32 = arith.constant 0 : i32
    %c0_i32_0 = arith.constant 0 : i32
    %c0_i32_1 = arith.constant 0 : i32
    return %c0_i32, %c0_i32_0 : i32, i32
  }
  func.func @transform_7(%arg0: i32) -> (i32, i32) {
    %c0_i32 = arith.constant 0 : i32
    %c0_i32_0 = arith.constant 0 : i32
    %c0_i32_1 = arith.constant 0 : i32
    return %c0_i32, %c0_i32_0 : i32, i32
  }
  func.func @transform_8(%arg0: i32) -> (i32, i32) {
    %c0_i32 = arith.constant 0 : i32
    %c0_i32_0 = arith.constant 0 : i32
    %c0_i32_1 = arith.constant 0 : i32
    return %c0_i32, %c0_i32_0 : i32, i32
  }
  func.func @transform_9(%arg0: i32) -> (i32, i32) {
    %c0_i32 = arith.constant 0 : i32
    %c0_i32_0 = arith.constant 0 : i32
    %c0_i32_1 = arith.constant 0 : i32
    return %c0_i32, %c0_i32_0 : i32, i32
  }
  func.func @transform_10(%arg0: i32) -> (i32, i32) {
    %c0_i32 = arith.constant 0 : i32
    %c0_i32_0 = arith.constant 0 : i32
    return %arg0, %c0_i32 : i32, i32
  }
  func.func @transform_11(%arg0: i32) -> (i32, i32) {
    %c0_i32 = arith.constant 0 : i32
    %c0_i32_0 = arith.constant 0 : i32
    return %arg0, %c0_i32 : i32, i32
  }
  func.func @transform_12(%arg0: i32) -> (i32, i32) {
    %c0_i32 = arith.constant 0 : i32
    %c0_i32_0 = arith.constant 0 : i32
    return %arg0, %c0_i32 : i32, i32
  }
}

</mosaic_0001>

<bundles_post_ra>
// kernel: mdrnn_cell_forward.1
= control target key start
LH: loop header
LB: loop body
LE: loop exit
PB: predicated region body
PF: predicated region fallthrough
CT: control target
= control target key end

     0   :  { %18 = vsyncpa [#allocation3], 0  ;;  %s1640_s0 = inlined_call_operand.vmem [shape: f32[8,3], index: 0, kind: input, shape index: {}]   ;;  %s1641_s1 = inlined_call_operand.vmem [shape: f32[8,32], index: 1, kind: input, shape index: {}]   ;;  %s1642_s2 = inlined_call_operand.vmem [shape: f32[8,128], index: 2, kind: input, shape index: {}]   ;;  %s1643_s3 = inlined_call_operand.vmem [shape: f32[8,128], index: 3, kind: input, shape index: {}]   ;;  %s1644_s4 = inlined_call_operand.hbm [shape: bf16[3,512], index: 4, kind: input, shape index: {}]   ;;  %s1645_s5 = inlined_call_operand.hbm [shape: bf16[32,512], index: 5, kind: input, shape index: {}]   ;;  %s1646_s6 = inlined_call_operand.hbm [shape: bf16[128,512], index: 6, kind: input, shape index: {}]   ;;  %s1647_s7 = inlined_call_operand.hbm [shape: f32[1,512], index: 7, kind: input, shape index: {}]   ;;  %s1648_s8 = inlined_call_operand.hbm [shape: bf16[128,384], index: 8, kind: input, shape index: {}]   ;;  %s1649_s9 = inlined_call_operand.hbm [shape: f32[1,384], index: 9, kind: input, shape index: {}]   ;;  %s1650_s10 = inlined_call_operand.hbm [shape: f32[8,128], index: 10, kind: output, shape index: {0}]   ;;  %s1651_s11 = inlined_call_operand.hbm [shape: f32[8,128], index: 11, kind: output, shape index: {1}]   ;;  %s1652_s12 = inlined_call_operand.vmem [shape: f32[8,384], index: 12, kind: output, shape index: {2}]  }
   0x1   :  { %19 = vsyncpa [#allocation6], 0 }
   0x2   :  { %20 = vsyncpa [#allocation9], 0 }
   0x3   :  { %21 = vsyncpa [#allocation12], 0 }
   0x4   :  { %22 = vsyncpa [#allocation4], 0 }
   0x5   :  { %23 = vsyncpa [#allocation15], 0  ;;  %s1473_s21 = smov [#allocation5]  }
   0x6   :  { %s47_s22 = sshll.u32 %s1473_s21, 4  ;;  %s48_s22 = int_to_ptr.vmem [resolvable:$true] %s47_s22 }
   0x7   :  { %s1309_s23 = scalar_lea.vmem %s48_s22, 1024  ;;  %p1314_p1 = scmp.lt.s32.totalorder %s48_s22, %s48_s22 }
   0x8   :  { %p1310_p0 = scmp.ne.s32.totalorder %s48_s22, %s1309_s23  ;;  %p1315_p2 = scmp.lt.s32.totalorder %s1309_s23, %s1309_s23 }
   0xa   :  { %p1316_p3 = por %p1315_p2, %p1314_p1 }
   0xc   :  { %p1317_p4 = pnand %p1316_p3, %p1310_p0 }
   0xe   :  { %1320 = shalt.err (!%p1317_p4)
}
   0xf   :  { %s1474_s24 = smov 256   ;;  %s1475_s25 = smov 16  }
  0x10   :  { %53 = dma.hbm_to_vmem [thread:$0]  %s1645_s5, 1024, %s48_s22, [#allocation6], %s1474_s24, %s1474_s24, %s1475_s25  }
  0x11   :  { %s1476_s28 = smov [#allocation8]   ;;  %s1477_s30 = smov [#allocation2]  }
  0x12   :  { %s72_s29 = sshll.u32 %s1476_s28, 4  ;;  %s38_s13 = sshll.u32 %s1477_s30, 4  ;;  %s73_s29 = int_to_ptr.vmem [resolvable:$true] %s72_s29  ;;  %s39_s13 = int_to_ptr.vmem [resolvable:$true] %s38_s13 }
  0x13   :  { %s1329_s14 = scalar_lea.vmem %s73_s29, 64  ;;  %p1334_p6 = scmp.lt.s32.totalorder %s73_s29, %s73_s29 }
  0x14   :  { %p1330_p5 = scmp.ne.s32.totalorder %s73_s29, %s1329_s14  ;;  %p1335_p7 = scmp.lt.s32.totalorder %s1329_s14, %s1329_s14 }
  0x16   :  { %p1336_p8 = por %p1335_p7, %p1334_p6 }
  0x18   :  { %p1337_p9 = pnand %p1336_p8, %p1330_p5 }
  0x1a   :  { %1340 = shalt.err (!%p1337_p9)
}
  0x1b   :  { %75 = dma.hbm_to_vmem [thread:$0]  %s1647_s7, 64, %s73_s29, [#allocation9]  }
  0x1c   :  { %s1349_s17 = scalar_lea.vmem %s39_s13, 128  ;;  %p1354_p11 = scmp.lt.s32.totalorder %s39_s13, %s39_s13 }
  0x1d   :  { %p1350_p10 = scmp.ne.s32.totalorder %s39_s13, %s1349_s17  ;;  %p1355_p12 = scmp.lt.s32.totalorder %s1349_s17, %s1349_s17 }
  0x1f   :  { %p1356_p13 = por %p1355_p12, %p1354_p11 }
  0x21   :  { %p1357_p0 = pnand %p1356_p13, %p1350_p10 }
  0x23   :  { %1360 = shalt.err (!%p1357_p0)
}
  0x24   :  { %41 = dma.hbm_to_vmem [thread:$0]  %s1644_s4, 128, %s39_s13, [#allocation3]  }
  0x25   :  { %s1478_s19 = smov [#allocation7]   ;;  %s1479_s21 = smov [#allocation10]  }
  0x26   :  { %s59_s20 = sshll.u32 %s1478_s19, 4  ;;  %s81_s22 = sshll.u32 %s1479_s21, 4  ;;  %s60_s20 = int_to_ptr.vmem [resolvable:$true] %s59_s20  ;;  %s82_s22 = int_to_ptr.vmem [resolvable:$true] %s81_s22 }
  0x27   :  { %s1369_s23 = scalar_lea.vmem %s60_s20, 4096  ;;  %p1374_p2 = scmp.lt.s32.totalorder %s60_s20, %s60_s20 }
  0x28   :  { %p1370_p1 = scmp.ne.s32.totalorder %s60_s20, %s1369_s23  ;;  %p1375_p3 = scmp.lt.s32.totalorder %s1369_s23, %s1369_s23 }
  0x2a   :  { %p1376_p4 = por %p1375_p3, %p1374_p2 }
  0x2c   :  { %p1377_p5 = pnand %p1376_p4, %p1370_p1 }
  0x2e   :  { %1380 = shalt.err (!%p1377_p5)
}
  0x2f   :  { %65 = dma.hbm_to_vmem [thread:$0]  %s1646_s6, 4096, %s60_s20, [#allocation6], %s1474_s24, %s1474_s24, %s1475_s25  }
  0x30   :  { %s1389_s4 = scalar_lea.vmem %s82_s22, 3072  ;;  %p1394_p7 = scmp.lt.s32.totalorder %s82_s22, %s82_s22 }
  0x31   :  { %p1390_p6 = scmp.ne.s32.totalorder %s82_s22, %s1389_s4  ;;  %p1395_p8 = scmp.lt.s32.totalorder %s1389_s4, %s1389_s4 }
  0x33   :  { %p1396_p9 = por %p1395_p8, %p1394_p7 }
  0x35   :  { %p1397_p10 = pnand %p1396_p9, %p1390_p6 }
  0x37   :  { %1400 = shalt.err (!%p1397_p10)
}
  0x38   :  { %s1480_s27 = smov 192   ;;  %s1481_s28 = smov 12  }
  0x39   :  { %87 = dma.hbm_to_vmem [thread:$0]  %s1648_s8, 3072, %s82_s22, [#allocation9], %s1480_s27, %s1480_s27, %s1481_s28  }
  0x3a   :  { %s1482_s13 = smov [#allocation11]  }
  0x3b   :  { %s94_s14 = sshll.u32 %s1482_s13, 4  ;;  %s95_s14 = int_to_ptr.vmem [resolvable:$true] %s94_s14 }
  0x3c   :  { %s1409_s15 = scalar_lea.vmem %s95_s14, 48  ;;  %s1413_s6 = scalar_lea.vmem %s95_s14, 64 }
  0x3d   :  { %p1410_p11 = scmp.ne.s32.totalorder %s95_s14, %s1409_s15  ;;  %p1414_p12 = scmp.lt.s32.totalorder %s95_s14, %s95_s14 }
  0x3e   :  { %p1415_p13 = scmp.lt.s32.totalorder %s1413_s6, %s1409_s15 }
  0x40   :  { %p1416_p0 = por %p1415_p13, %p1414_p12 }
  0x42   :  { %p1417_p1 = pnand %p1416_p0, %p1410_p11 }
  0x44   :  { %1420 = shalt.err (!%p1417_p1)
}
  0x45   :  { %97 = dma.hbm_to_vmem [thread:$0]  %s1649_s9, 48, %s95_s14, [#allocation12]  }
  0x46   :  { %1461 = dma.done.wait [#allocation3], 128  }
  0x47   :  { %1462 = vsyncadd [#allocation3], 4294967168 }
  0x48   :  { %1463 = dma.done.wait [#allocation6], 5120  }
  0x49   :  { %1464 = vsyncadd [#allocation6], 4294962176 }
  0x4a   :  { %1465 = dma.done.wait [#allocation9], 3136  }
  0x4b   :  { %1466 = vsyncadd [#allocation9], 4294964160 }
  0x4c   :  { %1467 = dma.done.wait [#allocation12], 48  }
  0x4d   :  { %1468 = vsyncadd [#allocation12], 4294967248  ;;  %v1483_v0 = vmov 0   ;;  %v1484_v1 = vmov 1983009808   ;;  %v261_v3 = vlaneseq  ;;  %vm278_vm0 = vcmask 1040384  }
  0x4e   :  { %206 = vmatprep.mubr.bf16.mxu0 %v1483_v0  ;;  %247 = vmatprep.mubr.bf16.mxu1 %v1483_v0  ;;  %v259_v2 = vunpack.c.l.s4 %v1484_v1  ;;  %v1184_v6 = vld [vmem:[#allocation5 + $0x24] ss:$16 sps:$4 sm:$0xff]   ;;  %v1186_v7 = vld [vmem:[#allocation5 + $0x2c] ss:$16 sps:$4 sm:$0xff]   ;;  %v1188_v8 = vld [vmem:[#allocation5 + $0x20] ss:$16 sps:$4 sm:$0xff]  }
  0x4f   :  { %v1582_v5 = vshrl.u32 %v261_v3, 7  ;;  %186 = vmatprep.subr.bf16.mxu0 %v1184_v6  ;;  %v1189_v9 = vld [vmem:[#allocation5 + $0x28] ss:$16 sps:$4 sm:$0xff]   ;;  %227 = vmatprep.subr.bf16.mxu1 %v1186_v7  ;;  %v1190_v11 = vld [vmem:[#allocation5 + $0x4] ss:$16 sps:$4 sm:$0xff]   ;;  %vm279_vm1 = vcmask 1041408  }
  0x50   :  { %v260_v4 = vunpack.c.0.s8 %v259_v2  ;;  %v1485_v12 = vmov 65535   ;;  %187 = vmatpush1.bf16.msra.mxu0 %v1188_v8  ;;  %228 = vmatpush1.bf16.msra.mxu1 %v1189_v9  ;;  %v1192_v14 = vld [vmem:[#allocation5 + $0xc] ss:$16 sps:$4 sm:$0xff]   ;;  %v1194_v15 = vld [vmem:[#allocation5] ss:$16 sps:$4 sm:$0xff]   ;;  %vm170_vm2 = vcmask 261120  }
  0x51   :  { %v280_v13 = vsel %vm278_vm0, 4294967295, %v1485_v12  ;;  %188 = vmatprep.subr.bf16.mxu0 %v1190_v11  ;;  %v1195_v16 = vld [vmem:[#allocation5 + $0x8] ss:$16 sps:$4 sm:$0xff]   ;;  %229 = vmatprep.subr.bf16.mxu1 %v1192_v14  ;;  %v1199_v28 = vld [vmem:[#allocation7 + $0xe4] ss:$16 sps:$4 sm:$0xff]   ;;  %vm274_vm3 = vcmask 23552  }
  0x52   :  { %v263_v10 = vsub.s32 %v260_v4, %v1582_v5  ;;  %v120_v17 = vld [vmem:[%s1641_s1] sm:$0xff]  ;;  %v281_v20 = vsel %vm279_vm1, %v280_v13, 0  ;;  %v1197_v33 = vld [vmem:[#allocation7 + $0xe0] ss:$16 sps:$4 sm:$0xff]   ;;  %v1205_v36 = vld [vmem:[#allocation7 + $0xc4] ss:$16 sps:$4 sm:$0xff]  }
  0x53   :  { %v119_v18 = vld [vmem:[#allocation2] sm:$0xff]  ;;  %v121_v22 = vpack.c.bf16 %v120_v17, %v120_v17  ;;  %v1203_v38 = vld [vmem:[#allocation7 + $0xc0] ss:$16 sps:$4 sm:$0xff]   ;;  %v1211_v40 = vld [vmem:[#allocation7 + $0xa4] ss:$16 sps:$4 sm:$0xff]   ;;  %v1486_v8 = vmov 0.0  }
  0x54   :  { %v264_v19 = vrot.slane %v119_v18, %v263_v10  ;;  %v257_v21 = vcombine.high %v119_v18, %v119_v18  ;;  %189 = vmatpush1.bf16.msra.mxu0 %v1194_v15  ;;  %230 = vmatpush1.bf16.msra.mxu1 %v1195_v16  ;;  %v1202_v31 = vld [vmem:[#allocation7 + $0xec] ss:$16 sps:$4 sm:$0xff]   ;;  %v1200_v35 = vld [vmem:[#allocation7 + $0xe8] ss:$16 sps:$4 sm:$0xff]   ;;  %v1209_v42 = vld [vmem:[#allocation7 + $0xa0] ss:$16 sps:$4 sm:$0xff]  }
  0x55   :  { %v117_v32 = vld [vmem:[%s1640_s0] sm:$0xff]  ;;  %v1217_v44 = vld [vmem:[#allocation7 + $0x84] ss:$16 sps:$4 sm:$0xff]   ;;  %v1215_v46 = vld [vmem:[#allocation7 + $0x80] ss:$16 sps:$4 sm:$0xff]   ;;  %vm1487_vm4 = vmmov 0  }
  0x56   :  { %v272_v23 = vcombine.high %v264_v19, %v264_v19  ;;  %v271_v24 = vrot.slane %v257_v21, %v263_v10  ;;  %v283_v25 = vand.u32 %v281_v20, %v264_v19  ;;  %v118_v34 = vpack.c.bf16 %v117_v32, %v117_v32  ;;  %v1208_v37 = vld [vmem:[#allocation7 + $0xcc] ss:$16 sps:$4 sm:$0xff]   ;;  %v1206_v39 = vld [vmem:[#allocation7 + $0xc8] ss:$16 sps:$4 sm:$0xff]   ;;  %v1223_v48 = vld [vmem:[#allocation7 + $0x64] ss:$16 sps:$4 sm:$0xff]  }
  0x57   :  { %1078 = vmatmul.mubr.msk.bf16.vlgmr.msra.gmra.mxu0 %vm170_vm2, %v121_v22  ;;  %1079 = vmatmul.mubr.msk.bf16.vlgmr.msra.gmra.mxu1 %vm170_vm2, %v121_v22  ;;  %v1214_v41 = vld [vmem:[#allocation7 + $0xac] ss:$16 sps:$4 sm:$0xff]   ;;  %v1212_v43 = vld [vmem:[#allocation7 + $0xa8] ss:$16 sps:$4 sm:$0xff]   ;;  %v1221_v50 = vld [vmem:[#allocation7 + $0x60] ss:$16 sps:$4 sm:$0xff]  }
  0x58   :  { %v286_v26 = vand.u32 %v281_v20, %v272_v23  ;;  %v273_v27 = vcombine.high %v271_v24, %v271_v24  ;;  %v289_v29 = vand.u32 %v281_v20, %v271_v24  ;;  %326 = vmatprep.mubr.bf16.mxu0 %v1483_v0  ;;  %367 = vmatprep.mubr.bf16.mxu1 %v1483_v0  ;;  %v1220_v45 = vld [vmem:[#allocation7 + $0x8c] ss:$16 sps:$4 sm:$0xff]   ;;  %v1218_v47 = vld [vmem:[#allocation7 + $0x88] ss:$16 sps:$4 sm:$0xff]   ;;  %v1229_v52 = vld [vmem:[#allocation7 + $0x44] ss:$16 sps:$4 sm:$0xff]  }
  0x59   :  { %v1226_v49 = vld [vmem:[#allocation7 + $0x6c] ss:$16 sps:$4 sm:$0xff]   ;;  %v1224_v51 = vld [vmem:[#allocation7 + $0x68] ss:$16 sps:$4 sm:$0xff]   ;;  %v1227_v54 = vld [vmem:[#allocation7 + $0x40] ss:$16 sps:$4 sm:$0xff]  }
  0x5a   :  { %308 = vmatprep.subr.bf16.mxu0 %v286_v26  ;;  %v292_v30 = vand.u32 %v281_v20, %v273_v27  ;;  %v1232_v53 = vld [vmem:[#allocation7 + $0x4c] ss:$16 sps:$4 sm:$0xff]   ;;  %v1230_v55 = vld [vmem:[#allocation7 + $0x48] ss:$16 sps:$4 sm:$0xff]   ;;  %v1235_v56 = vld [vmem:[#allocation7 + $0x24] ss:$16 sps:$4 sm:$0xff]  }
  0x5b   :  { %309 = vmatpush1.bf16.msra.mxu0 %v283_v25  ;;  %v1238_v57 = vld [vmem:[#allocation7 + $0x2c] ss:$16 sps:$4 sm:$0xff]   ;;  %v1233_v58 = vld [vmem:[#allocation7 + $0x20] ss:$16 sps:$4 sm:$0xff]   ;;  %v1236_v59 = vld [vmem:[#allocation7 + $0x28] ss:$16 sps:$4 sm:$0xff]  }
  0x5c   :  { %349 = vmatprep.subr.bf16.mxu1 %v292_v30  ;;  %570 = vmatprep.subr.bf16.mxu0 %v1199_v28  ;;  %v1241_v60 = vld [vmem:[#allocation7 + $0x4] ss:$16 sps:$4 sm:$0xff]   ;;  %v1244_v61 = vld [vmem:[#allocation7 + $0xc] ss:$16 sps:$4 sm:$0xff]   ;;  %v1239_v62 = vld [vmem:[#allocation7] ss:$16 sps:$4 sm:$0xff]  }
  0x5d   :  { %350 = vmatpush1.bf16.msra.mxu1 %v289_v29  ;;  %v1242_v63 = vld [vmem:[#allocation7 + $0x8] ss:$16 sps:$4 sm:$0xff]   ;;  %v1247_v4 = vld [vmem:[#allocation10 + $0xac] ss:$12 sps:$4 sm:$0xff]   ;;  %v1248_v7 = vld [vmem:[#allocation10 + $0xb0] ss:$12 sps:$4 sm:$0xff]  }
  0x5e   :  { %611 = vmatprep.subr.bf16.mxu1 %v1202_v31  ;;  %v376_v1 = vld [vmem:[%s1642_s2] sm:$0xff]  ;;  %v1249_v10 = vld [vmem:[#allocation10 + $0x90] ss:$12 sps:$4 sm:$0xff]   ;;  %v1256_v14 = vld [vmem:[#allocation10 + $0x80] ss:$12 sps:$4 sm:$0xff]   ;;  %s1488_s21 = smov [#allocation13]  }
  0x5f   :  { %1080 = vmatmul.mubr.msk.bf16.vlgmr.msra.gmra.mxu0 %vm274_vm3, %v118_v34  ;;  %v377_v2 = vpack.c.bf16 %v376_v1, %v376_v1  ;;  %v1245_v6 = vld [vmem:[#allocation10 + $0xa8] ss:$12 sps:$4 sm:$0xff]   ;;  %v1252_v11 = vld [vmem:[#allocation10 + $0x98] ss:$12 sps:$4 sm:$0xff]   ;;  %v1257_v15 = vld [vmem:[#allocation10 + $0x60] ss:$12 sps:$4 sm:$0xff]  }
  0x60   :  { %1081 = vmatmul.mubr.msk.bf16.vlgmr.msra.gmra.mxu1 %vm274_vm3, %v118_v34  ;;  %571 = vmatpush1.bf16.msra.mxu0 %v1197_v33  ;;  %v1251_v9 = vld [vmem:[#allocation10 + $0x94] ss:$12 sps:$4 sm:$0xff]   ;;  %v1255_v12 = vld [vmem:[#allocation10 + $0x7c] ss:$12 sps:$4 sm:$0xff]   ;;  %v1253_v13 = vld [vmem:[#allocation10 + $0x78] ss:$12 sps:$4 sm:$0xff]  }
  0x61   :  { %612 = vmatpush1.bf16.msra.mxu1 %v1200_v35  ;;  %572 = vmatprep.subr.bf16.mxu0 %v1205_v36  ;;  %v1260_v16 = vld [vmem:[#allocation10 + $0x68] ss:$12 sps:$4 sm:$0xff]   ;;  %v1263_v18 = vld [vmem:[#allocation10 + $0x4c] ss:$12 sps:$4 sm:$0xff]   ;;  %v1264_v19 = vld [vmem:[#allocation10 + $0x50] ss:$12 sps:$4 sm:$0xff]  }
  0x62   :  { %613 = vmatprep.subr.bf16.mxu1 %v1208_v37  ;;  %602 = vmatprep.mubr.bf16.mxu0 %v1483_v0  ;;  %v1261_v17 = vld [vmem:[#allocation10 + $0x48] ss:$12 sps:$4 sm:$0xff]   ;;  %v1265_v21 = vld [vmem:[#allocation10 + $0x30] ss:$12 sps:$4 sm:$0xff]   ;;  %v1268_v22 = vld [vmem:[#allocation10 + $0x38] ss:$12 sps:$4 sm:$0xff]  }
  0x63   :  { %643 = vmatprep.mubr.bf16.mxu1 %v1483_v0  ;;  %v1267_v20 = vld [vmem:[#allocation10 + $0x34] ss:$12 sps:$4 sm:$0xff]   ;;  %v1271_v23 = vld [vmem:[#allocation10 + $0x1c] ss:$12 sps:$4 sm:$0xff]   ;;  %v1269_v24 = vld [vmem:[#allocation10 + $0x18] ss:$12 sps:$4 sm:$0xff]  }
  0x64   :  { %573 = vmatpush1.bf16.msra.mxu0 %v1203_v38  ;;  %v1272_v25 = vld [vmem:[#allocation10 + $0x20] ss:$12 sps:$4 sm:$0xff]   ;;  %v1275_v26 = vld [vmem:[#allocation10 + $0x4] ss:$12 sps:$4 sm:$0xff]   ;;  %v1276_v28 = vld [vmem:[#allocation10 + $0x8] ss:$12 sps:$4 sm:$0xff]  }
  0x65   :  { %614 = vmatpush1.bf16.msra.mxu1 %v1206_v39  ;;  %574 = vmatprep.subr.bf16.mxu0 %v1211_v40  ;;  %v1273_v27 = vld [vmem:[#allocation10] ss:$12 sps:$4 sm:$0xff]   ;;  %s1040_s22 = sshll.u32 %s1488_s21, 4  ;;  %s1489_s23 = smov [#allocation14]   ;;  %s1041_s22 = int_to_ptr.vmem [resolvable:$true] %s1040_s22 }
  0x66   :  { %615 = vmatprep.subr.bf16.mxu1 %v1214_v41  ;;  %s1050_s7 = sshll.u32 %s1489_s23, 4  ;;  %s1421_s26 = scalar_lea.vmem %s1041_s22, 128  ;;  %s1051_s7 = int_to_ptr.vmem [resolvable:$true] %s1050_s7 }
  0x67   :  { %p1422_p2 = scmp.ne.s32.totalorder %s1041_s22, %s1421_s26  ;;  %p1426_p3 = scmp.lt.s32.totalorder %s1041_s22, %s1041_s22 }
  0x68   :  { %575 = vmatpush1.bf16.msra.mxu0 %v1209_v42  ;;  %p1427_p4 = scmp.lt.s32.totalorder %s1421_s26, %s1421_s26 }
  0x69   :  { %616 = vmatpush1.bf16.msra.mxu1 %v1212_v43  ;;  %576 = vmatprep.subr.bf16.mxu0 %v1217_v44 }
  0x6a   :  { %617 = vmatprep.subr.bf16.mxu1 %v1220_v45  ;;  %v660_v45 = vsub.s32 0, %v1582_v5  ;;  %p1428_p5 = por %p1427_p4, %p1426_p3 }
  0x6c   :  { %577 = vmatpush1.bf16.msra.mxu0 %v1215_v46  ;;  %v656_v46 = vld [vmem:[#allocation8] sm:$0xf]  ;;  %p1429_p6 = pnand %p1428_p5, %p1422_p2 }
  0x6d   :  { %618 = vmatpush1.bf16.msra.mxu1 %v1218_v47  ;;  %578 = vmatprep.subr.bf16.mxu0 %v1223_v48  ;;  %v664_v47 = vsub.s32 1, %v1582_v5 }
  0x6e   :  { %619 = vmatprep.subr.bf16.mxu1 %v1226_v49  ;;  %v661_v49 = vrot.slane %v656_v46, %v660_v45 }
  0x70   :  { %579 = vmatpush1.bf16.msra.mxu0 %v1221_v50 }
  0x71   :  { %620 = vmatpush1.bf16.msra.mxu1 %v1224_v51  ;;  %580 = vmatprep.subr.bf16.mxu0 %v1229_v52 }
  0x72   :  { %621 = vmatprep.subr.bf16.mxu1 %v1232_v53 }
  0x74   :  { %581 = vmatpush1.bf16.msra.mxu0 %v1227_v54  ;;  %v665_v54 = vrot.slane %v656_v46, %v664_v47 }
  0x75   :  { %622 = vmatpush1.bf16.msra.mxu1 %v1230_v55  ;;  %582 = vmatprep.subr.bf16.mxu0 %v1235_v56 }
  0x76   :  { %623 = vmatprep.subr.bf16.mxu1 %v1238_v57 }
  0x78   :  { %583 = vmatpush1.bf16.msra.mxu0 %v1233_v58 }
  0x79   :  { %624 = vmatpush1.bf16.msra.mxu1 %v1236_v59  ;;  %584 = vmatprep.subr.bf16.mxu0 %v1241_v60  ;;  %v672_v59 = vsub.s32 3, %v1582_v5 }
  0x7a   :  { %625 = vmatprep.subr.bf16.mxu1 %v1244_v61 }
  0x7c   :  { %585 = vmatpush1.bf16.msra.mxu0 %v1239_v62 }
  0x7d   :  { %626 = vmatpush1.bf16.msra.mxu1 %v1242_v63  ;;  %887 = vmatprep.subr.bf16.mxu0 %v1247_v4 }
  0x7e   :  { %1147 = vmatprep.subr.bf16.mxu1 %v1486_v8 }
  0x7f   :  { %603 = vmatmul.mubr.bf16.vlgmr.msra.gmra.mxu0 %v377_v2 }
  0x80   :  { %644 = vmatmul.mubr.bf16.vlgmr.msra.gmra.mxu1 %v377_v2  ;;  %919 = vmatprep.mubr.bf16.mxu0 %v1483_v0  ;;  %v1259_v0 = vld [vmem:[#allocation10 + $0x64] ss:$12 sps:$4 sm:$0xff]  }
  0x81   :  { %888 = vmatpush1.bf16.msra.mxu0 %v1245_v6  ;;  %1148 = vmatpush3.bf16.msra.mxu1 %v1248_v7 }
  0x82   :  { %1149 = vmatprep.subr.bf16.mxu1 %v1486_v8  ;;  %889 = vmatprep.subr.bf16.mxu0 %v1251_v9  ;;  %v673_v9 = vrot.slane %v656_v46, %v672_v59 }
  0x83   :  { %1163 = vmatprep.mubr.msk.bf16.mxu1 %vm1487_vm4, %v1486_v8 }
  0x85   :  { %890 = vmatpush1.bf16.msra.mxu0 %v1249_v10  ;;  %1150 = vmatpush3.bf16.msra.mxu1 %v1252_v11 }
  0x86   :  { %1151 = vmatprep.subr.bf16.mxu1 %v1486_v8  ;;  %891 = vmatprep.subr.bf16.mxu0 %v1255_v12  ;;  %v668_v12 = vsub.s32 2, %v1582_v5 }
  0x89   :  { %892 = vmatpush1.bf16.msra.mxu0 %v1253_v13  ;;  %1152 = vmatpush3.bf16.msra.mxu1 %v1256_v14 }
  0x8a   :  { %1153 = vmatprep.subr.bf16.mxu1 %v1486_v8  ;;  %893 = vmatprep.subr.bf16.mxu0 %v1259_v0 }
  0x8d   :  { %894 = vmatpush1.bf16.msra.mxu0 %v1257_v15  ;;  %1154 = vmatpush3.bf16.msra.mxu1 %v1260_v16  ;;  %v669_v15 = vrot.slane %v656_v46, %v668_v12 }
  0x8e   :  { %1155 = vmatprep.subr.bf16.mxu1 %v1486_v8  ;;  %895 = vmatprep.subr.bf16.mxu0 %v1263_v18 }
  0x91   :  { %896 = vmatpush1.bf16.msra.mxu0 %v1261_v17  ;;  %1156 = vmatpush3.bf16.msra.mxu1 %v1264_v19 }
  0x92   :  { %897 = vmatprep.subr.bf16.mxu0 %v1267_v20  ;;  %1157 = vmatprep.subr.bf16.mxu1 %v1486_v8 }
  0x95   :  { %898 = vmatpush1.bf16.msra.mxu0 %v1265_v21  ;;  %1158 = vmatpush3.bf16.msra.mxu1 %v1268_v22 }
  0x96   :  { %899 = vmatprep.subr.bf16.mxu0 %v1271_v23  ;;  %1159 = vmatprep.subr.bf16.mxu1 %v1486_v8 }
  0x99   :  { %900 = vmatpush1.bf16.msra.mxu0 %v1269_v24  ;;  %1160 = vmatpush3.bf16.msra.mxu1 %v1272_v25  ;;  %v701_v24 = vld [vmem:[%s1643_s3] sm:$0xff] }
  0x9a   :  { %901 = vmatprep.subr.bf16.mxu0 %v1275_v26  ;;  %1161 = vmatprep.subr.bf16.mxu1 %v1486_v8 }
  0x9d   :  { %902 = vmatpush1.bf16.msra.mxu0 %v1273_v27  ;;  %1162 = vmatpush3.bf16.msra.mxu1 %v1276_v28 }
 0x117   :  { %v208_v29 = vpop.f32.mrf.mxu0  ;;  %v249_v30 = vpop.f32.mrf.mxu1 }
 0x119   :  { %v210_v31 = vpop.f32.mrf.mxu0  ;;  %v251_v32 = vpop.f32.mrf.mxu1 }
 0x11b   :  { %v212_v33 = vpop.f32.mrf.mxu0  ;;  %v253_v34 = vpop.f32.mrf.mxu1 }
 0x11d   :  { %v213_v35 = vpop.f32.mrf.mxu0  ;;  %v254_v36 = vpop.f32.mrf.mxu1 }
 0x11e   :  { %v742_v35 = vld [vmem:[#allocation11] sm:$0x7] }
 0x11f   :  { %v328_v37 = vpop.f32.mrf.mxu0  ;;  %v747_v36 = vrot.slane %v742_v35, %v660_v45 }
 0x120   :  { %v369_v38 = vpop.f32.mrf.mxu1  ;;  %v329_v48 = vadd.f32 %v328_v37, %v208_v29  ;;  %v755_v37 = vrot.slane %v742_v35, %v668_v12 }
 0x121   :  { %v330_v39 = vpop.f32.mrf.mxu0  ;;  %v370_v13 = vadd.f32 %v369_v38, %v249_v30  ;;  %v751_v38 = vrot.slane %v742_v35, %v664_v47 }
 0x122   :  { %v371_v40 = vpop.f32.mrf.mxu1  ;;  %v331_v52 = vadd.f32 %v330_v39, %v210_v31 }
 0x123   :  { %v332_v41 = vpop.f32.mrf.mxu0  ;;  %v372_v1 = vadd.f32 %v371_v40, %v251_v32 }
 0x124   :  { %v373_v42 = vpop.f32.mrf.mxu1 }
 0x125   :  { %v333_v43 = vpop.f32.mrf.mxu0 }
 0x126   :  { %v374_v44 = vpop.f32.mrf.mxu1 }
 0x13f   :  { %v604_v50 = vpop.f32.mrf.mxu0 }
 0x140   :  { %v645_v51 = vpop.f32.mrf.mxu1  ;;  %v652_v53 = vadd.f32 %v604_v50, %v329_v48 }
 0x141   :  { %v606_v55 = vpop.f32.mrf.mxu0  ;;  %v654_v0 = vadd.f32 %v645_v51, %v370_v13  ;;  %v969_v51 = vand.u32 127, %v261_v3 }
 0x142   :  { %v647_v56 = vpop.f32.mrf.mxu1  ;;  %v678_v57 = vadd.f32 %v661_v49, %v652_v53  ;;  %v653_v58 = vadd.f32 %v606_v55, %v331_v52 }
 0x143   :  { %v608_v60 = vpop.f32.mrf.mxu0  ;;  %v655_v8 = vadd.f32 %v647_v56, %v372_v1  ;;  %v680_v18 = vadd.f32 %v669_v15, %v654_v0  ;;  %v971_v52 = vadd.s32 256, %v969_v51  ;;  %v970_v53 = vadd.s32 128, %v969_v51 }
 0x144   :  { %v649_v61 = vpop.f32.mrf.mxu1  ;;  %v682_v62 = vsub.f32 0.0, %v678_v57  ;;  %v679_v63 = vadd.f32 %v665_v54, %v653_v58 }
 0x145   :  { %v609_v2 = vpop.f32.mrf.mxu0  ;;  %v681_v11 = vadd.f32 %v673_v9, %v655_v8  ;;  %vm983_vm5 = vcmp.ge.s32.totalorder %v971_v52, 320  ;;  %vm986_vm6 = vcmp.lt.s32.totalorder %v971_v52, 325  ;;  %vm977_vm7 = vcmp.lt.s32.totalorder %v971_v52, 320 }
 0x146   :  { %v650_v4 = vpop.f32.mrf.mxu1  ;;  %v683_v6 = vmul.f32 1.442695, %v682_v62  ;;  %v688_v7 = vsub.f32 0.0, %v679_v63  ;;  %vm1618_vm8 = vmand %vm983_vm5, %vm986_vm6  ;;  %vm973_vm9 = vcmp.ge.s32.totalorder %v970_v53, 160 }
 0x147   :  { %v695_v14 = vsub.f32 0.0, %v681_v11 }
 0x148   :  { %1277 = vpow2.f32 %v683_v6  ;;  %v689_v10 = vmul.f32 1.442695, %v688_v7 }
 0x149   :  { %v696_v16 = vmul.f32 1.442695, %v695_v14 }
 0x14a   :  { %1279 = vpow2.f32 %v689_v10 }
 0x14b   :  { %1281 = vpow2.f32 %v696_v16 }
 0x155   :  { %v1278_v17 = vpop.eup %1277 }
 0x156   :  { %v685_v19 = vadd.f32 1.0, %v1278_v17 }
 0x157   :  { %v1280_v20 = vpop.eup %1279 }
 0x158   :  { %1283 = vrcp.f32 %v685_v19  ;;  %v691_v21 = vadd.f32 1.0, %v1280_v20  ;;  %v1282_v22 = vpop.eup %1281 }
 0x159   :  { %1285 = vtanh.f32 %v680_v18  ;;  %v698_v27 = vadd.f32 1.0, %v1282_v22 }
 0x15a   :  { %1287 = vrcp.f32 %v691_v21 }
 0x15b   :  { %1289 = vrcp.f32 %v698_v27 }
 0x165   :  { %v1284_v23 = vpop.eup %1283 }
 0x166   :  { %v1286_v25 = vpop.eup %1285 }
 0x167   :  { %v1288_v26 = vpop.eup %1287  ;;  %v703_v28 = vmul.f32 %v1286_v25, %v1284_v23 }
 0x168   :  { %v702_v29 = vmul.f32 %v1288_v26, %v701_v24  ;;  %v1290_v31 = vpop.eup %1289 }
 0x16a   :  { %v704_v30 = vadd.f32 %v703_v28, %v702_v29 }
 0x16c   :  { %708 = vst [vmem:[#allocation14] sm:$0xff] %v704_v30  ;;  %1291 = vtanh.f32 %v704_v30 }
 0x179   :  { %v1292_v32 = vpop.eup %1291 }
 0x17a   :  { %v706_v33 = vmul.f32 %v1292_v32, %v1290_v31 }
 0x17c   :  { %v709_v34 = vpack.c.bf16 %v706_v33, %v706_v33  ;;  %707 = vst [vmem:[#allocation13] sm:$0xff] %v706_v33 }
 0x17e   :  { %920 = vmatmul.mubr.bf16.vlgmr.msra.gmra.mxu0 %v709_v34  ;;  %1164 = vmatmul.mubr.bf16.vlgmr.msra.gmra.mxu1 %v709_v34 }
 0x23e   :  { %v921_v39 = vpop.f32.mrf.mxu0  ;;  %v962_v40 = vpop.f32.mrf.mxu1 }
 0x23f   :  { %v922_v41 = vadd.f32 %v921_v39, %v747_v36  ;;  %v963_v42 = vadd.f32 %v962_v40, %v755_v37 }
 0x240   :  { %v923_v43 = vpop.f32.mrf.mxu0  ;;  %v1165_v44 = vpop.f32.mrf.mxu1 }
 0x241   :  { %1031 = vst [vmem:[%s1652_s12] sm:$0xff] %v922_v41  ;;  %v994_v46 = vmul.f32 1.442695, %v963_v42  ;;  %v924_v48 = vadd.f32 %v923_v43, %v751_v38 }
 0x242   :  { %v925_v49 = vpop.f32.mrf.mxu0  ;;  %v965_v50 = vpop.f32.mrf.mxu1 }
 0x243   :  { %1293 = vpow2.f32 %v994_v46  ;;  %v992_v45 = vmul.f32 1.442695, %v924_v48 }
 0x244   :  { %v926_v5 = vpop.f32.mrf.mxu0  ;;  %v1166_v47 = vpop.f32.mrf.mxu1 }
 0x245   :  { %1295 = vpow2.f32 %v992_v45 }
 0x250   :  { %v1294_v55 = vpop.eup %1293 }
 0x251   :  { %v998_v56 = vsel %vm977_vm7, %v1294_v55, %v963_v42 }
 0x252   :  { %v1296_v57 = vpop.eup %1295  ;;  %v1001_v58 = vsel %vm1618_vm8, %v998_v56, -1e+30 }
 0x253   :  { %v997_v3 = vsel %vm973_vm9, %v1296_v57, %v924_v48  ;;  %v1003_v59 = vmax.f32 %v1001_v58, -1e+30 }
 0x254   :  { %1032 = vst [vmem:[%s1652_s12 + $0x8] sm:$0xff] %v997_v3 }
 0x255   :  { %1004 = vmax.xlane.f32.xlu0 %v1003_v59 }
 0x2de   :  { %v1005_v60 = vpop.xlane.xlu0 %1004 }
 0x2df   :  { %v1008_v61 = vsub.f32 %v998_v56, %v1005_v60 }
 0x2e1   :  { %v1013_v62 = vmul.f32 1.442695, %v1008_v61 }
 0x2e3   :  { %1297 = vpow2.f32 %v1013_v62 }
 0x2f0   :  { %v1298_v63 = vpop.eup %1297 }
 0x2f1   :  { %v1017_v1 = vsel %vm1618_vm8, %v1298_v63, 0.0 }
 0x2f2   :  { %1020 = vadd.xlane.f32.xlu0 %v1017_v1 }
 0x2f3   :  { %1432 = shalt.err (!%p1429_p6)
}
 0x2f4   :  { %1043 = dma.vmem_to_hbm [thread:$0]  %s1041_s22, 128, %s1650_s10, [#allocation4]  }
 0x2f5   :  { %s1441_s28 = scalar_lea.vmem %s1051_s7, 128  ;;  %p1446_p8 = scmp.lt.s32.totalorder %s1051_s7, %s1051_s7 }
 0x2f6   :  { %p1442_p7 = scmp.ne.s32.totalorder %s1051_s7, %s1441_s28  ;;  %p1447_p9 = scmp.lt.s32.totalorder %s1441_s28, %s1441_s28 }
 0x2f8   :  { %p1448_p10 = por %p1447_p9, %p1446_p8 }
 0x2fa   :  { %p1449_p11 = pnand %p1448_p10, %p1442_p7 }
 0x2fc   :  { %1452 = shalt.err (!%p1449_p11)
}
 0x2fd   :  { %1053 = dma.vmem_to_hbm [thread:$0]  %s1051_s7, 128, %s1651_s11, [#allocation15]  }
 0x37b   :  { %v1021_v2 = vpop.xlane.xlu0 %1020 }
 0x37c   :  { %1299 = vlog2.f32 %v1021_v2 }
 0x389   :  { %v1300_v4 = vpop.eup %1299 }
 0x38a   :  { %v1023_v6 = vmul.f32 0.6931472, %v1300_v4 }
 0x38c   :  { %v1024_v7 = vadd.f32 %v1023_v6, %v1005_v60 }
 0x38e   :  { %v1027_v8 = vsub.f32 %v998_v56, %v1024_v7 }
 0x390   :  { %v1030_v9 = vsel %vm1618_vm8, %v1027_v8, %v998_v56 }
 0x391   :  { %1033 = vst [vmem:[%s1652_s12 + $0x10] sm:$0xff] %v1030_v9 }
 0x392   :  { %1469 = dma.done.wait [#allocation4], 128  }
 0x393   :  { %1470 = vsyncadd [#allocation4], 4294967168 }
 0x394   :  { %1471 = dma.done.wait [#allocation15], 128  }
 0x395   :  { %1472 = vsyncadd [#allocation15], 4294967168 }
 0x396   :  { %1064 = vsyncpa [#allocation3], 1 }
 0x397   :  { %1065 = vsyncpa [#allocation6], 1 }
 0x398   :  { %1066 = vsyncpa [#allocation9], 1 }
 0x399   :  { %1067 = vsyncpa [#allocation12], 1 }
 0x39a   :  { %1068 = vsyncpa [#allocation4], 1 }
 0x39b   :  { %1069 = vsyncpa [#allocation15], 1 }

</bundles_post_ra>
